<compile_context>
chip_gen: v7x
topology: tpu7x:2x2x1
jax: 0.10.0
libtpu: 0.0.40
codegen_flags: <defaults>
</compile_context>

<pallas_src>
import numpy as np
import jax
import jax.numpy as jnp
from jax import lax
from jax.experimental import pallas as pl
from jax.experimental.pallas import tpu as pltpu

# HungarianMatcher cost weights (original DETR defaults).
COST_CLASS, COST_BBOX, COST_GIOU = 1.0, 5.0, 2.0
_EPS = 1e-9


def _vmem_budget_bytes():
    """Half of physical VMEM (re-derived per chip: 128 MiB v5e/v6e, 64 MiB v7x)."""
    try:
        cap = int(pltpu.get_tpu_info().vmem_capacity_bytes)
    except Exception:
        cap = 64 * 1024 * 1024
    return cap // 2


# ----------------------------- kernel 1: matcher pairwise cost -----------------------------
def _matcher_cost_kernel(logits_ref, pboxt_ref, tlab_ref, tbox_ref, cost_ref):
    # Stream in native dtype (bf16 upstream), upcast here.
    logits = logits_ref[0].astype(jnp.float32)     # [TQ, Cnd]  queries x non-dummy classes
    pb = pboxt_ref[0].astype(jnp.float32)          # [4, TQ]    component-major pred boxes
    labels = tlab_ref[0]                           # [Tpad, 1]  int32
    tb = tbox_ref[0].astype(jnp.float32)           # [Tpad, 4]  target boxes cxcywh
    TQ, Cnd = logits.shape
    T = tb.shape[0]

    # softmax class probabilities (lanes = Cnd); exact EUP reciprocal keeps assignment parity
    m = jnp.max(logits, axis=-1, keepdims=True)
    e = jnp.exp(logits - m)
    prob = e * pl.reciprocal(jnp.sum(e, axis=-1, keepdims=True))         # [TQ, Cnd]

    # class cost[t, q] = -prob[q, labels[t]] : f32 one-hot contraction on the idle MXU.
    onehot = (lax.broadcasted_iota(jnp.int32, (T, Cnd), 1) == labels).astype(jnp.float32)
    cost = (-COST_CLASS) * lax.dot_general(
        onehot, prob, dimension_numbers=(((1,), (1,)), ((), ())),
        preferred_element_type=jnp.float32)                              # [T, TQ]

    # component-major box math — lane-dense [T, TQ] tiles throughout; accumulate straight
    # into the single cost tile to keep live vregs down.
    pcx, pcy, pw, ph = pb[0:1, :], pb[1:2, :], pb[2:3, :], pb[3:4, :]    # [1, TQ]
    tcx, tcy, tw, th = tb[:, 0:1], tb[:, 1:2], tb[:, 2:3], tb[:, 3:4]    # [T, 1]

    cost += COST_BBOX * (jnp.abs(pcx - tcx) + jnp.abs(pcy - tcy)
                         + jnp.abs(pw - tw) + jnp.abs(ph - th))          # L1 cdist

    px0, py0, px1, py1 = pcx - 0.5 * pw, pcy - 0.5 * ph, pcx + 0.5 * pw, pcy + 0.5 * ph
    tx0, ty0, tx1, ty1 = tcx - 0.5 * tw, tcy - 0.5 * th, tcx + 0.5 * tw, tcy + 0.5 * th
    area_p = (px1 - px0) * (py1 - py0)                                   # [1, TQ]
    area_t = (tx1 - tx0) * (ty1 - ty0)                                   # [T, 1]
    iw = jnp.maximum(jnp.minimum(px1, tx1) - jnp.maximum(px0, tx0), 0.0)
    ih = jnp.maximum(jnp.minimum(py1, ty1) - jnp.maximum(py0, ty0), 0.0)
    inter = iw * ih                                                      # [T, TQ]
    union = jnp.maximum(area_p + area_t - inter, _EPS)   # clamp: degenerate / padded boxes
    ew = jnp.maximum(jnp.maximum(px1, tx1) - jnp.minimum(px0, tx0), 0.0)
    eh = jnp.maximum(jnp.maximum(py1, ty1) - jnp.minimum(py0, ty0), 0.0)
    earea = jnp.maximum(ew * eh, _EPS)
    giou = (inter * pl.reciprocal(union)
            - (earea - union) * pl.reciprocal(earea))                    # [T, TQ]

    cost_ref[0] = cost - COST_GIOU * giou


def matcher_costs(logits_nd, pred_boxes, tgt_labels, tgt_boxes):
    """Pairwise matching cost, lane-dense [B, T, Q] (computed on padded Qpad/Tpad tiles)."""
    B, Q, Cnd = logits_nd.shape
    T = tgt_boxes.shape[1]
    Tpad = max(8, -(-T // 8) * 8)
    in_bytes = jnp.dtype(logits_nd.dtype).itemsize
    budget = _vmem_budget_bytes()

    def ws_bytes(tq):  # double-buffered blocks + rough live-intermediate estimate
        blocks = 2 * (tq * Cnd * in_bytes + 8 * tq * in_bytes
                      + 2 * Tpad * 128 * 4 + Tpad * tq * 4)
        scratch = 8 * Tpad * tq * 4 + 2 * tq * Cnd * 4
        return blocks + scratch

    q128 = -(-Q // 128) * 128
    cap = 1024 if Tpad <= 16 else 512          # bound [Tpad, TQ] live-vreg pressure
    tq = 128
    for cand in range(256, min(q128, cap) + 1, 128):
        if ws_bytes(cand) <= budget:
            tq = cand
    tq = min(tq, q128)
    Qpad = -(-Q // tq) * tq                    # tiles divide exactly -> no remainder blocks

    if Qpad != Q:
        logits_nd = jnp.pad(logits_nd, ((0, 0), (0, Qpad - Q), (0, 0)))
        pred_boxes = jnp.pad(pred_boxes, ((0, 0), (0, Qpad - Q), (0, 0)))
    if Tpad != T:
        tgt_boxes = jnp.pad(tgt_boxes, ((0, 0), (0, Tpad - T), (0, 0)))
        tgt_labels = jnp.pad(tgt_labels, ((0, 0), (0, Tpad - T)))

    pboxes_t = jnp.transpose(pred_boxes, (0, 2, 1))                      # [B, 4, Qpad]
    labels3 = tgt_labels.reshape(B, Tpad, 1).astype(jnp.int32)

    cost = pl.pallas_call(
        _matcher_cost_kernel,
        out_shape=jax.ShapeDtypeStruct((B, Tpad, Qpad), jnp.float32),
        grid=(B, Qpad // tq),
        in_specs=[
            pl.BlockSpec((1, tq, Cnd), lambda b, qi: (b, qi, 0)),
            pl.BlockSpec((1, 4, tq), lambda b, qi: (b, 0, qi)),
            pl.BlockSpec((1, Tpad, 1), lambda b, qi: (b, 0, 0)),
            pl.BlockSpec((1, Tpad, 4), lambda b, qi: (b, 0, 0)),
        ],
        out_specs=pl.BlockSpec((1, Tpad, tq), lambda b, qi: (b, 0, qi)),
        compiler_params=pltpu.CompilerParams(
            dimension_semantics=("parallel", "parallel"),
            vmem_limit_bytes=int(budget)),
    )(logits_nd, pboxes_t, labels3, tgt_boxes)
    return cost[:, :T, :Q]


# ------------------- kernel 2: fused weighted cross-entropy + cardinality -------------------
def _make_ce_card_kernel(q_total, tq):
    def kernel(logits_ref, tcls_ref, w_ref, num_ref, den_ref, card_ref):
        qi = pl.program_id(1)
        logits = logits_ref[0].astype(jnp.float32)   # [TQ, C]
        tcls = tcls_ref[0]                           # [TQ, 1] int32
        w = w_ref[...].astype(jnp.float32)           # [1, C]
        TQb, C = logits.shape

        # log-softmax over classes (lane-dense)
        m = jnp.max(logits, axis=-1, keepdims=True)
        shifted = logits - m
        lse = jnp.log(jnp.sum(jnp.exp(shifted), axis=-1, keepdims=True))
        logp = shifted - lse                                             # [TQ, C]

        lane = lax.broadcasted_iota(jnp.int32, (TQb, C), 1)
        mask = lane == tcls                                              # [TQ, C] bool
        nll_row = -jnp.sum(jnp.where(mask, logp, 0.0), axis=-1, keepdims=True)   # [TQ, 1]
        w_row = jnp.sum(jnp.where(mask, w, 0.0), axis=-1, keepdims=True)         # [TQ, 1]

        # cardinality: argmax != C-1  (mask last class in place; no lane-slice relayout)
        is_last = lane == (C - 1)
        last_val = jnp.sum(jnp.where(is_last, logits, 0.0), axis=-1, keepdims=True)
        rest_max = jnp.max(jnp.where(is_last, -jnp.inf, logits), axis=-1, keepdims=True)
        not_last = (rest_max >= last_val).astype(jnp.float32)            # [TQ, 1]

        # mask padded query rows (partial last tile)
        row = lax.broadcasted_iota(jnp.int32, (TQb, 1), 0) + qi * tq
        valid = row < q_total
        # Independent per-(b, qi) partials: no serialized accumulation chain, both grid
        # axes "parallel" (lets v7x shard Q-tiles across its two TensorCores).
        num_ref[0, 0] = jnp.sum(jnp.where(valid, w_row * nll_row, 0.0))
        den_ref[0, 0] = jnp.sum(jnp.where(valid, w_row, 0.0))
        card_ref[0, 0] = jnp.sum(jnp.where(valid, not_last, 0.0))

    return kernel


def ce_and_cardinality(logits, target_classes, empty_weight):
    """Per-batch CE numerator/denominator and predicted-box count, one pass over logits."""
    B, Q, C = logits.shape
    in_bytes = jnp.dtype(logits.dtype).itemsize
    budget = _vmem_budget_bytes()

    def ws_bytes(tq):
        return 2 * (tq * C * in_bytes + tq * 128 * 4 + 8 * C * 4) + 5 * tq * C * 4

    tq = 128
    for cand in range(256, 1024 + 1, 128):
        if ws_bytes(cand) <= budget:
            tq = cand
    if Q <= tq:
        tq = Q                                   # single full-extent tile, no padded rows
    n_qt = pl.cdiv(Q, tq)

    tcls3 = target_classes.reshape(B, Q, 1).astype(jnp.int32)
    # TODO(synk): the (TQ, 1) int32 class block pads to a (TQ, 128) VMEM slab; a lane-dense
    # layout would need an in-kernel lane->sublane relayout, so it is kept and budgeted for.
    scalar_spec = pl.BlockSpec((1, 1), lambda b, qi: (b, qi),
                               memory_space=pltpu.MemorySpace.SMEM)
    num, den, card = pl.pallas_call(
        _make_ce_card_kernel(Q, tq),
        out_shape=(jax.ShapeDtypeStruct((B, n_qt), jnp.float32),
                   jax.ShapeDtypeStruct((B, n_qt), jnp.float32),
                   jax.ShapeDtypeStruct((B, n_qt), jnp.float32)),
        grid=(B, n_qt),
        in_specs=[
            pl.BlockSpec((1, tq, C), lambda b, qi: (b, qi, 0)),
            pl.BlockSpec((1, tq, 1), lambda b, qi: (b, qi, 0)),
            pl.BlockSpec((1, C), lambda b, qi: (0, 0)),
        ],
        out_specs=(scalar_spec, scalar_spec, scalar_spec),
        compiler_params=pltpu.CompilerParams(
            dimension_semantics=("parallel", "parallel"),
            vmem_limit_bytes=int(budget)),
    )(logits, tcls3, empty_weight)
    # tiny final reduction over query tiles in plain JAX
    return jnp.sum(num, axis=1), jnp.sum(den, axis=1), jnp.sum(card, axis=1)


# ----------------------------- host-side Hungarian assignment -----------------------------
def _hungarian(cost):
    """Min-cost assignment of each row (target) to a distinct column (query), n <= m.
    Shortest-augmenting-path Hungarian (Jonker-Volgenant style), O(n^2 m), pure numpy."""
    cost = np.asarray(cost, dtype=np.float64)
    n, m = cost.shape
    assert n <= m, "Hungarian assignment expects #targets <= #queries"
    u = np.zeros(n + 1)
    v = np.zeros(m + 1)
    p = np.zeros(m + 1, dtype=np.int64)          # p[j] = row (1-based) assigned to column j
    way = np.zeros(m + 1, dtype=np.int64)
    for i in range(1, n + 1):
        p[0] = i
        j0 = 0
        minv = np.full(m + 1, np.inf)
        used = np.zeros(m + 1, dtype=bool)
        while True:
            used[j0] = True
            i0 = p[j0]
            free = ~used
            free[0] = False
            cur = cost[i0 - 1, :] - u[i0] - v[1:]
            upd = free[1:] & (cur < minv[1:])
            minv[1:][upd] = cur[upd]
            way[1:][upd] = j0
            masked = np.where(free[1:], minv[1:], np.inf)
            j1 = int(np.argmin(masked)) + 1
            delta = masked[j1 - 1]
            u[p[used]] += delta
            v[used] -= delta
            minv[~used] -= delta
            j0 = j1
            if p[j0] == 0:
                break
        while j0 != 0:
            j1 = way[j0]
            p[j0] = p[j1]
            j0 = j1
    col_ind = np.zeros(n, dtype=np.int64)
    for j in range(1, m + 1):
        if p[j] > 0:
            col_ind[p[j] - 1] = j - 1
    return np.arange(n, dtype=np.int64), col_ind


# ----------------------------- tiny jnp helpers (matched pairs) -----------------------------
def _box_cxcywh_to_xyxy(b):
    cx, cy, w, h = b[..., 0], b[..., 1], b[..., 2], b[..., 3]
    return jnp.stack([cx - 0.5 * w, cy - 0.5 * h, cx + 0.5 * w, cy + 0.5 * h], axis=-1)


def _giou_diag_cxcywh(src, tgt):
    """Diagonal (matched-pair) GIoU for [N, 4] cxcywh boxes."""
    s = _box_cxcywh_to_xyxy(src)
    t = _box_cxcywh_to_xyxy(tgt)
    area_s = (s[:, 2] - s[:, 0]) * (s[:, 3] - s[:, 1])
    area_t = (t[:, 2] - t[:, 0]) * (t[:, 3] - t[:, 1])
    iw = jnp.maximum(jnp.minimum(s[:, 2], t[:, 2]) - jnp.maximum(s[:, 0], t[:, 0]), 0.0)
    ih = jnp.maximum(jnp.minimum(s[:, 3], t[:, 3]) - jnp.maximum(s[:, 1], t[:, 1]), 0.0)
    inter = iw * ih
    union = area_s + area_t - inter
    iou = inter / union
    ew = jnp.maximum(jnp.maximum(s[:, 2], t[:, 2]) - jnp.minimum(s[:, 0], t[:, 0]), 0.0)
    eh = jnp.maximum(jnp.maximum(s[:, 3], t[:, 3]) - jnp.minimum(s[:, 1], t[:, 1]), 0.0)
    earea = ew * eh
    return iou - (earea - union) / earea


# ----------------------------- SetCriterion (JAX/Pallas) -----------------------------
class SetCriterionPallas:
    def __init__(self, num_classes, num_non_dummy_classes, eos_coef, losses):
        self.num_classes = num_classes
        self.num_non_dummy_classes = num_non_dummy_classes
        self.eos_coef = eos_coef
        self.losses = losses
        for loss in losses:
            if loss not in ('labels', 'cardinality', 'boxes'):
                raise ValueError(f'unknown loss {loss}')
        w = np.ones(num_classes, np.float32)
        w[num_non_dummy_classes:] = eos_coef
        self.empty_weight = jnp.asarray(w).reshape(1, num_classes)

    def _matcher(self, logits_nd, pred_boxes, tgt_labels, tgt_boxes):
        # Pairwise cost matrix on TPU (Pallas, lane-dense [B, T, Q]); assignment on host.
        # TODO(synk): for real wall-clock the blocking device_get is the ceiling — overlap
        # it with the CE/box-loss launches once the assignment-free parts are scheduled.
        cost = np.asarray(jax.device_get(
            matcher_costs(logits_nd, pred_boxes, tgt_labels, tgt_boxes)))   # [B, T, Q]
        indices = []
        for b in range(cost.shape[0]):
            rows, cols = _hungarian(cost[b])       # rows = targets, cols = queries
            src = cols.astype(np.int64)
            tgt = rows.astype(np.int64)
            order = np.argsort(src)
            indices.append((src[order], tgt[order]))
        return indices

    def __call__(self, outputs, targets):
        logits = outputs['logits']            # [B, Q, C]
        pred_boxes = outputs['pred_boxes']    # [B, Q, 4]
        B, Q, C = logits.shape

        # matcher sees logits sliced to non-dummy classes (and truncated class_labels),
        # mirroring the reference implementation's assumptions about T vs num_non_dummy.
        tgt_boxes = jnp.stack([jnp.asarray(t['boxes']) for t in targets])   # [B, T, 4]
        tgt_labels = jnp.stack(
            [jnp.asarray(t['class_labels'])[:self.num_non_dummy_classes]
             for t in targets]).astype(jnp.int32)                           # [B, T]
        logits_nd = logits[..., :self.num_non_dummy_classes]
        indices = self._matcher(logits_nd, pred_boxes, tgt_labels, tgt_boxes)

        num_boxes = float(sum(len(t['class_labels']) for t in targets))

        batch_idx = np.concatenate([np.full_like(s, i) for i, (s, _) in enumerate(indices)])
        src_idx = np.concatenate([s for s, _ in indices])

        losses = {}
        need_labels = 'labels' in self.losses
        need_card = 'cardinality' in self.losses

        if need_labels or need_card:
            # one fused kernel streams logits once and yields both CE and cardinality stats
            tc = np.full((B, Q), self.num_classes - 1, np.int32)
            tco = np.concatenate([np.asarray(t['class_labels'])[np.asarray(j)]
                                  for t, (_, j) in zip(targets, indices)]).astype(np.int32)
            tc[batch_idx, src_idx] = tco
            num, den, card = ce_and_cardinality(logits, jnp.asarray(tc), self.empty_weight)
            if need_labels:
                losses['loss_ce'] = jnp.sum(num) / jnp.sum(den)
            if need_card:
                tlen = jnp.asarray([float(len(t['class_labels'])) for t in targets],
                                   jnp.float32)
                losses['cardinality_error'] = jnp.mean(jnp.abs(card - tlen))

        if 'boxes' in self.losses:
            # [N, 4] with N ~ tens: plain jnp beats a pallas_call launch here.
            src_boxes = pred_boxes[batch_idx, src_idx]                      # [N, 4]
            target_boxes = jnp.concatenate(
                [jnp.asarray(t['boxes'])[np.asarray(j)]
                 for t, (_, j) in zip(targets, indices)], axis=0)           # [N, 4]
            losses['loss_bbox'] = jnp.sum(jnp.abs(src_boxes - target_boxes)) / num_boxes
            giou = _giou_diag_cxcywh(src_boxes, target_boxes)
            losses['loss_giou'] = jnp.sum(1.0 - giou) / num_boxes

        return losses


if __name__ == "__main__":
    key = jax.random.PRNGKey(0)
    B, Q, C, Cnd, T = 2, 8, 16, 12, 3

    k1, k2, k3, k4, k5, k6 = jax.random.split(key, 6)
    logits = jax.random.normal(k1, (B, Q, C), jnp.float32)
    cxcy = jax.random.uniform(k2, (B, Q, 2), minval=0.2, maxval=0.8)
    wh = jax.random.uniform(k3, (B, Q, 2), minval=0.05, maxval=0.3)
    pred_boxes = jnp.concatenate([cxcy, wh], axis=-1).astype(jnp.float32)

    tcxcy = jax.random.uniform(k4, (B, T, 2), minval=0.2, maxval=0.8)
    twh = jax.random.uniform(k5, (B, T, 2), minval=0.05, maxval=0.3)
    tgt_boxes_all = jnp.concatenate([tcxcy, twh], axis=-1).astype(jnp.float32)
    tgt_labels_all = jax.random.randint(k6, (B, T), 0, Cnd)

    outputs = {'logits': logits, 'pred_boxes': pred_boxes}
    targets = [{'boxes': tgt_boxes_all[b], 'class_labels': tgt_labels_all[b]}
               for b in range(B)]

    criterion = SetCriterionPallas(num_classes=C, num_non_dummy_classes=Cnd,
                                   eos_coef=0.1,
                                   losses=['labels', 'boxes', 'cardinality'])
    losses = criterion(outputs, targets)
    jax.block_until_ready(losses)
    print("KERNEL_OK")
</pallas_src>

<mosaic_0001>
module attributes {stable_mosaic.version = 11 : i64} {
  func.func @_matcher_cost_kernel(%arg0: i32, %arg1: i32, %arg2: memref<1x128x12xf32, #tpu.memory_space<vmem>>, %arg3: memref<1x4x128xf32, #tpu.memory_space<vmem>>, %arg4: memref<1x8x1xi32, #tpu.memory_space<vmem>>, %arg5: memref<1x8x4xf32, #tpu.memory_space<vmem>>, %arg6: memref<1x8x128xf32, #tpu.memory_space<vmem>>) attributes {dimension_semantics = [#tpu.dimension_semantics<parallel>, #tpu.dimension_semantics<parallel>], iteration_bounds = array<i64: 2, 1>, scalar_prefetch = 0 : i64, scratch_operands = 0 : i64, tpu.core_type = #tpu.core_type<tc>, window_params = [{transform_indices = @transform_0, window_bounds = array<i64: 1, 128, 12>}, {transform_indices = @transform_1, window_bounds = array<i64: 1, 4, 128>}, {transform_indices = @transform_2, window_bounds = array<i64: 1, 8, 1>}, {transform_indices = @transform_3, window_bounds = array<i64: 1, 8, 4>}, {transform_indices = @transform_4, window_bounds = array<i64: 1, 8, 128>}]} {
    %c0 = arith.constant 0 : index
    %c0_0 = arith.constant 0 : index
    %c0_1 = arith.constant 0 : index
    %0 = vector.load %arg2[%c0, %c0_0, %c0_1] : memref<1x128x12xf32, #tpu.memory_space<vmem>>, vector<1x128x12xf32>
    %1 = vector.shape_cast %0 : vector<1x128x12xf32> to vector<128x12xf32>
    %c0_2 = arith.constant 0 : index
    %c0_3 = arith.constant 0 : index
    %c0_4 = arith.constant 0 : index
    %2 = vector.load %arg3[%c0_2, %c0_3, %c0_4] : memref<1x4x128xf32, #tpu.memory_space<vmem>>, vector<1x4x128xf32>
    %3 = vector.shape_cast %2 : vector<1x4x128xf32> to vector<4x128xf32>
    %c0_5 = arith.constant 0 : index
    %c0_6 = arith.constant 0 : index
    %c0_7 = arith.constant 0 : index
    %4 = vector.load %arg4[%c0_5, %c0_6, %c0_7] : memref<1x8x1xi32, #tpu.memory_space<vmem>>, vector<1x8x1xi32>
    %5 = vector.shape_cast %4 : vector<1x8x1xi32> to vector<8x1xi32>
    %c0_8 = arith.constant 0 : index
    %c0_9 = arith.constant 0 : index
    %c0_10 = arith.constant 0 : index
    %6 = vector.load %arg5[%c0_8, %c0_9, %c0_10] : memref<1x8x4xf32, #tpu.memory_space<vmem>>, vector<1x8x4xf32>
    %7 = vector.shape_cast %6 : vector<1x8x4xf32> to vector<8x4xf32>
    %cst = arith.constant dense<0xFF800000> : vector<128xf32>
    %8 = vector.multi_reduction <maximumf>, %1, %cst [1] : vector<128x12xf32> to vector<128xf32>
    %9 = vector.shape_cast %8 : vector<128xf32> to vector<128x1xf32>
    %10 = vector.broadcast %9 : vector<128x1xf32> to vector<128x12xf32>
    %11 = arith.subf %1, %10 : vector<128x12xf32>
    %12 = math.exp %11 : vector<128x12xf32>
    %cst_11 = arith.constant dense<0.000000e+00> : vector<128xf32>
    %13 = vector.multi_reduction <add>, %12, %cst_11 [1] : vector<128x12xf32> to vector<128xf32>
    %14 = vector.shape_cast %13 : vector<128xf32> to vector<128x1xf32>
    %15 = tpu.reciprocal %14 : vector<128x1xf32> -> vector<128x1xf32>
    %16 = vector.broadcast %15 : vector<128x1xf32> to vector<128x12xf32>
    %17 = arith.mulf %12, %16 : vector<128x12xf32>
    %18 = tpu.iota {dimensions = array<i32: 1>} : vector<8x12xi32>
    %19 = vector.broadcast %5 : vector<8x1xi32> to vector<8x12xi32>
    %20 = arith.cmpi eq, %18, %19 : vector<8x12xi32>
    %21 = arith.extui %20 : vector<8x12xi1> to vector<8x12xi32>
    %22 = arith.sitofp %21 : vector<8x12xi32> to vector<8x12xf32>
    %cst_12 = arith.constant dense<0.000000e+00> : vector<8x128xf32>
    %23 = tpu.matmul %22, %17, %cst_12 {dimension_numbers = #tpu.dot_dimension_numbers<[1], [1], [0], [0], [0, 0, 1, 0], [], []>} : vector<8x12xf32>, vector<128x12xf32>, vector<8x128xf32> -> vector<8x128xf32>
    %cst_13 = arith.constant -1.000000e+00 : f32
    %24 = vector.broadcast %cst_13 : f32 to vector<8x128xf32>
    %25 = arith.mulf %24, %23 : vector<8x128xf32>
    %26 = vector.extract_strided_slice %3 {offsets = [0, 0], sizes = [1, 128], strides = [1, 1]} : vector<4x128xf32> to vector<1x128xf32>
    %27 = vector.extract_strided_slice %3 {offsets = [1, 0], sizes = [1, 128], strides = [1, 1]} : vector<4x128xf32> to vector<1x128xf32>
    %28 = vector.extract_strided_slice %3 {offsets = [2, 0], sizes = [1, 128], strides = [1, 1]} : vector<4x128xf32> to vector<1x128xf32>
    %29 = vector.extract_strided_slice %3 {offsets = [3, 0], sizes = [1, 128], strides = [1, 1]} : vector<4x128xf32> to vector<1x128xf32>
    %30 = vector.extract_strided_slice %7 {offsets = [0, 0], sizes = [8, 1], strides = [1, 1]} : vector<8x4xf32> to vector<8x1xf32>
    %31 = vector.extract_strided_slice %7 {offsets = [0, 1], sizes = [8, 1], strides = [1, 1]} : vector<8x4xf32> to vector<8x1xf32>
    %32 = vector.extract_strided_slice %7 {offsets = [0, 2], sizes = [8, 1], strides = [1, 1]} : vector<8x4xf32> to vector<8x1xf32>
    %33 = vector.extract_strided_slice %7 {offsets = [0, 3], sizes = [8, 1], strides = [1, 1]} : vector<8x4xf32> to vector<8x1xf32>
    %34 = vector.broadcast %26 : vector<1x128xf32> to vector<8x128xf32>
    %35 = vector.broadcast %30 : vector<8x1xf32> to vector<8x128xf32>
    %36 = arith.subf %34, %35 : vector<8x128xf32>
    %37 = math.absf %36 : vector<8x128xf32>
    %38 = vector.broadcast %27 : vector<1x128xf32> to vector<8x128xf32>
    %39 = vector.broadcast %31 : vector<8x1xf32> to vector<8x128xf32>
    %40 = arith.subf %38, %39 : vector<8x128xf32>
    %41 = math.absf %40 : vector<8x128xf32>
    %42 = arith.addf %37, %41 : vector<8x128xf32>
    %43 = vector.broadcast %28 : vector<1x128xf32> to vector<8x128xf32>
    %44 = vector.broadcast %32 : vector<8x1xf32> to vector<8x128xf32>
    %45 = arith.subf %43, %44 : vector<8x128xf32>
    %46 = math.absf %45 : vector<8x128xf32>
    %47 = arith.addf %42, %46 : vector<8x128xf32>
    %48 = vector.broadcast %29 : vector<1x128xf32> to vector<8x128xf32>
    %49 = vector.broadcast %33 : vector<8x1xf32> to vector<8x128xf32>
    %50 = arith.subf %48, %49 : vector<8x128xf32>
    %51 = math.absf %50 : vector<8x128xf32>
    %52 = arith.addf %47, %51 : vector<8x128xf32>
    %cst_14 = arith.constant 5.000000e+00 : f32
    %53 = vector.broadcast %cst_14 : f32 to vector<8x128xf32>
    %54 = arith.mulf %53, %52 : vector<8x128xf32>
    %55 = arith.addf %25, %54 : vector<8x128xf32>
    %cst_15 = arith.constant 5.000000e-01 : f32
    %56 = vector.broadcast %cst_15 : f32 to vector<1x128xf32>
    %57 = arith.mulf %56, %28 : vector<1x128xf32>
    %58 = arith.subf %26, %57 : vector<1x128xf32>
    %cst_16 = arith.constant 5.000000e-01 : f32
    %59 = vector.broadcast %cst_16 : f32 to vector<1x128xf32>
    %60 = arith.mulf %59, %29 : vector<1x128xf32>
    %61 = arith.subf %27, %60 : vector<1x128xf32>
    %cst_17 = arith.constant 5.000000e-01 : f32
    %62 = vector.broadcast %cst_17 : f32 to vector<1x128xf32>
    %63 = arith.mulf %62, %28 : vector<1x128xf32>
    %64 = arith.addf %26, %63 : vector<1x128xf32>
    %cst_18 = arith.constant 5.000000e-01 : f32
    %65 = vector.broadcast %cst_18 : f32 to vector<1x128xf32>
    %66 = arith.mulf %65, %29 : vector<1x128xf32>
    %67 = arith.addf %27, %66 : vector<1x128xf32>
    %cst_19 = arith.constant 5.000000e-01 : f32
    %68 = vector.broadcast %cst_19 : f32 to vector<8x1xf32>
    %69 = arith.mulf %68, %32 : vector<8x1xf32>
    %70 = arith.subf %30, %69 : vector<8x1xf32>
    %cst_20 = arith.constant 5.000000e-01 : f32
    %71 = vector.broadcast %cst_20 : f32 to vector<8x1xf32>
    %72 = arith.mulf %71, %33 : vector<8x1xf32>
    %73 = arith.subf %31, %72 : vector<8x1xf32>
    %cst_21 = arith.constant 5.000000e-01 : f32
    %74 = vector.broadcast %cst_21 : f32 to vector<8x1xf32>
    %75 = arith.mulf %74, %32 : vector<8x1xf32>
    %76 = arith.addf %30, %75 : vector<8x1xf32>
    %cst_22 = arith.constant 5.000000e-01 : f32
    %77 = vector.broadcast %cst_22 : f32 to vector<8x1xf32>
    %78 = arith.mulf %77, %33 : vector<8x1xf32>
    %79 = arith.addf %31, %78 : vector<8x1xf32>
    %80 = arith.subf %64, %58 : vector<1x128xf32>
    %81 = arith.subf %67, %61 : vector<1x128xf32>
    %82 = arith.mulf %80, %81 : vector<1x128xf32>
    %83 = arith.subf %76, %70 : vector<8x1xf32>
    %84 = arith.subf %79, %73 : vector<8x1xf32>
    %85 = arith.mulf %83, %84 : vector<8x1xf32>
    %86 = vector.broadcast %64 : vector<1x128xf32> to vector<8x128xf32>
    %87 = vector.broadcast %76 : vector<8x1xf32> to vector<8x128xf32>
    %88 = arith.minimumf %86, %87 : vector<8x128xf32>
    %89 = vector.broadcast %58 : vector<1x128xf32> to vector<8x128xf32>
    %90 = vector.broadcast %70 : vector<8x1xf32> to vector<8x128xf32>
    %91 = arith.maximumf %89, %90 : vector<8x128xf32>
    %92 = arith.subf %88, %91 : vector<8x128xf32>
    %cst_23 = arith.constant 0.000000e+00 : f32
    %93 = vector.broadcast %cst_23 : f32 to vector<8x128xf32>
    %94 = arith.maximumf %92, %93 : vector<8x128xf32>
    %95 = vector.broadcast %67 : vector<1x128xf32> to vector<8x128xf32>
    %96 = vector.broadcast %79 : vector<8x1xf32> to vector<8x128xf32>
    %97 = arith.minimumf %95, %96 : vector<8x128xf32>
    %98 = vector.broadcast %61 : vector<1x128xf32> to vector<8x128xf32>
    %99 = vector.broadcast %73 : vector<8x1xf32> to vector<8x128xf32>
    %100 = arith.maximumf %98, %99 : vector<8x128xf32>
    %101 = arith.subf %97, %100 : vector<8x128xf32>
    %cst_24 = arith.constant 0.000000e+00 : f32
    %102 = vector.broadcast %cst_24 : f32 to vector<8x128xf32>
    %103 = arith.maximumf %101, %102 : vector<8x128xf32>
    %104 = arith.mulf %94, %103 : vector<8x128xf32>
    %105 = vector.broadcast %82 : vector<1x128xf32> to vector<8x128xf32>
    %106 = vector.broadcast %85 : vector<8x1xf32> to vector<8x128xf32>
    %107 = arith.addf %105, %106 : vector<8x128xf32>
    %108 = arith.subf %107, %104 : vector<8x128xf32>
    %cst_25 = arith.constant 9.99999971E-10 : f32
    %109 = vector.broadcast %cst_25 : f32 to vector<8x128xf32>
    %110 = arith.maximumf %108, %109 : vector<8x128xf32>
    %111 = vector.broadcast %64 : vector<1x128xf32> to vector<8x128xf32>
    %112 = vector.broadcast %76 : vector<8x1xf32> to vector<8x128xf32>
    %113 = arith.maximumf %111, %112 : vector<8x128xf32>
    %114 = vector.broadcast %58 : vector<1x128xf32> to vector<8x128xf32>
    %115 = vector.broadcast %70 : vector<8x1xf32> to vector<8x128xf32>
    %116 = arith.minimumf %114, %115 : vector<8x128xf32>
    %117 = arith.subf %113, %116 : vector<8x128xf32>
    %cst_26 = arith.constant 0.000000e+00 : f32
    %118 = vector.broadcast %cst_26 : f32 to vector<8x128xf32>
    %119 = arith.maximumf %117, %118 : vector<8x128xf32>
    %120 = vector.broadcast %67 : vector<1x128xf32> to vector<8x128xf32>
    %121 = vector.broadcast %79 : vector<8x1xf32> to vector<8x128xf32>
    %122 = arith.maximumf %120, %121 : vector<8x128xf32>
    %123 = vector.broadcast %61 : vector<1x128xf32> to vector<8x128xf32>
    %124 = vector.broadcast %73 : vector<8x1xf32> to vector<8x128xf32>
    %125 = arith.minimumf %123, %124 : vector<8x128xf32>
    %126 = arith.subf %122, %125 : vector<8x128xf32>
    %cst_27 = arith.constant 0.000000e+00 : f32
    %127 = vector.broadcast %cst_27 : f32 to vector<8x128xf32>
    %128 = arith.maximumf %126, %127 : vector<8x128xf32>
    %129 = arith.mulf %119, %128 : vector<8x128xf32>
    %cst_28 = arith.constant 9.99999971E-10 : f32
    %130 = vector.broadcast %cst_28 : f32 to vector<8x128xf32>
    %131 = arith.maximumf %129, %130 : vector<8x128xf32>
    %132 = tpu.reciprocal %110 : vector<8x128xf32> -> vector<8x128xf32>
    %133 = arith.mulf %104, %132 : vector<8x128xf32>
    %134 = arith.subf %131, %110 : vector<8x128xf32>
    %135 = tpu.reciprocal %131 : vector<8x128xf32> -> vector<8x128xf32>
    %136 = arith.mulf %134, %135 : vector<8x128xf32>
    %137 = arith.subf %133, %136 : vector<8x128xf32>
    %cst_29 = arith.constant 2.000000e+00 : f32
    %138 = vector.broadcast %cst_29 : f32 to vector<8x128xf32>
    %139 = arith.mulf %138, %137 : vector<8x128xf32>
    %140 = arith.subf %55, %139 : vector<8x128xf32>
    %c0_30 = arith.constant 0 : index
    %c0_31 = arith.constant 0 : index
    %c0_32 = arith.constant 0 : index
    %141 = vector.load %arg6[%c0_30, %c0_31, %c0_32] : memref<1x8x128xf32, #tpu.memory_space<vmem>>, vector<1x8x128xf32>
    %142 = vector.shape_cast %141 : vector<1x8x128xf32> to vector<8x128xf32>
    %143 = vector.shape_cast %140 : vector<8x128xf32> to vector<1x8x128xf32>
    tpu.vector_store %arg6[%c0_30, %c0_31, %c0_32], %143 {strides = array<i32>} : memref<1x8x128xf32, #tpu.memory_space<vmem>>, vector<1x8x128xf32>,
    return
  }
  func.func @transform_0(%arg0: i32, %arg1: i32) -> (i32, i32, i32) {
    %c0_i32 = arith.constant 0 : i32
    %c0_i32_0 = arith.constant 0 : i32
    return %arg0, %arg1, %c0_i32 : i32, i32, i32
  }
  func.func @transform_1(%arg0: i32, %arg1: i32) -> (i32, i32, i32) {
    %c0_i32 = arith.constant 0 : i32
    %c0_i32_0 = arith.constant 0 : i32
    return %arg0, %c0_i32, %arg1 : i32, i32, i32
  }
  func.func @transform_2(%arg0: i32, %arg1: i32) -> (i32, i32, i32) {
    %c0_i32 = arith.constant 0 : i32
    %c0_i32_0 = arith.constant 0 : i32
    %c0_i32_1 = arith.constant 0 : i32
    return %arg0, %c0_i32, %c0_i32_0 : i32, i32, i32
  }
  func.func @transform_3(%arg0: i32, %arg1: i32) -> (i32, i32, i32) {
    %c0_i32 = arith.constant 0 : i32
    %c0_i32_0 = arith.constant 0 : i32
    %c0_i32_1 = arith.constant 0 : i32
    return %arg0, %c0_i32, %c0_i32_0 : i32, i32, i32
  }
  func.func @transform_4(%arg0: i32, %arg1: i32) -> (i32, i32, i32) {
    %c0_i32 = arith.constant 0 : i32
    %c0_i32_0 = arith.constant 0 : i32
    return %arg0, %c0_i32, %arg1 : i32, i32, i32
  }
}

</mosaic_0001>

<bundles_post_ra>
// kernel: tpu_custom_call.1
= control target key start
LH: loop header
LB: loop body
LE: loop exit
PB: predicated region body
PF: predicated region fallthrough
CT: control target
= control target key end

     0   :  { %9 = vsyncpa [#allocation3], 0  ;;  %s1587_s0 = inlined_call_operand.vmem [shape: f32[2,128,12], index: 0, kind: input, shape index: {}]   ;;  %s1588_s1 = inlined_call_operand.vmem [shape: f32[2,4,128], index: 1, kind: input, shape index: {}]   ;;  %s1589_s2 = inlined_call_operand.vmem [shape: s32[2,8,1], index: 2, kind: input, shape index: {}]   ;;  %s1590_s3 = inlined_call_operand.vmem [shape: f32[2,8,4], index: 3, kind: input, shape index: {}]   ;;  %s1591_s4 = inlined_call_operand.hbm [shape: f32[2,8,128], index: 4, kind: output, shape index: {}]  }
   0x1   :  { %11 = vsyncpa [#allocation3 + $0x1], 0  ;;  %s1259_s15 = smov 0   ;;  %s1261_s16 = smov 0  }
   0x2   :  { %s1263_s17 = smov 0   ;;  %s1265_s18 = smov 0  }
   0x3   :  { %s1267_s19 = smov 0   ;;  %s1269_s20 = smov 0  }
   0x4 LB: > { %s886_s21 = sadd.s32 4294967295, %s1222_s20   ;;  %s887_s22 = sadd.s32 4294967294, %s1222_s20   ;;  %s1222_s20 = sphi %s1269_s20, %s17_s20   ;;  %s1218_s19 = sphi %s1267_s19, %s1600_s19   ;;  %s1214_s18 = sphi %s1265_s18, %s1599_s18   ;;  %s1210_s17 = sphi %s1263_s17, %s1598_s17   ;;  %s1206_s16 = sphi %s1261_s16, %s1597_s16   ;;  %s1202_s15 = sphi %s1259_s15, %s1596_s15  }
   0x5   : > { %s29_s23 = sadd.s32 1, %s1218_s19  ;;  %s146_s24 = sadd.s32 1, %s1210_s17 }
   0x6   : > { %p31_p0 = scmp.ge.s32.totalorder %s29_s23, 2  ;;  %p156_p1 = scmp.ne.s32.totalorder %s1210_s17, %s1206_s16 }
   0x7   : > { %p157_p2 = scmp.eq.s32.totalorder %s886_s21, 1  ;;  %p162_p3 = scmp.ne.s32.totalorder %s1206_s16, %s1202_s15 }
   0x8   : > { %s1602_s23 = smov (%p31_p0, %s29_s23), 0  ;;  %p163_p5 = scmp.eq.s32.totalorder %s887_s22, 1 }
   0x9   : > { %p1299_p4 = por %p157_p2, %p156_p1  ;;  %s141_s26 = ssub.s32 %s1218_s19, %s1602_s23 }
   0xa   : > { %p890_p6 = scmp.ge.s32.totalorder %s1222_s20, 1  ;;  %p144_p7 = scmp.eq.s32.totalorder %s141_s26, 0 }
   0xb   : > { %p1306_p8 = por %p163_p5, %p162_p3  ;;  %p218_p9 = scmp.lt.s32.totalorder %s1222_s20, 3 }
   0xc   : > { %s1312_s28 = scalar_select %p144_p7, %s1210_s17, %s146_s24  }
   0xd   : > { %p219_p10 = pnand %p890_p6, %p218_p9 }
   0xe   : > { %p264_p11 = scmp.lt.s32.totalorder (!%p219_p10), %s1214_s18, 1  ;;  %vm307_vm0 = vcmask (!%p219_p10), 97280   ;;  %v1224_v32 = vmov (!%p219_p10), 0   ;;  %s1226_s21 = smov (!%p219_p10), 126   ;;  %vm1228_vm1 = vmmov (!%p219_p10), 0  }
   0xf   : > { %222 = sbr.rel (%p219_p10) target bundleno = 653 (0x28d), region = 36  ;;  %1068 = vset.pattern.permute.xlu0 (!%p219_p10), %v1224_v32  ;;  %1069 = vset.pattern.permute.xlu1 (!%p219_p10), %v1224_v32  ;;  %vm1481_vm2 = vmpackc.low (!%p219_p10), %vm307_vm0, %vm307_vm0  ;;  %s1230_s22 = smov (!%p219_p10), 127  }
  0x16   : > { %s1316_s29 = scalar_select %p264_p11, %s1214_s18, 1 }
  0x18   : > { %s919_s30 = sshll.u32 %s1316_s29, 7  ;;  %s895_s8 = sshll.u32 %s1316_s29, 3 }
  0x19   : > { %s1322_s7 = scalar_lea.vmem %s1587_s0, %s919_s30  ;;  %s287_s11 = scalar_lea.vmem %s1590_s3, %s895_s8 }
  0x1a   : > { %v288_v0 = vld [vmem:[%s1322_s7] sm:$0xff]  ;;  %v290_v1 = vld [vmem:[%s1322_s7 + $0x10] sm:$0xff]  ;;  %v289_v2 = vld [vmem:[%s1322_s7 + $0x8] sm:$0xff]  ;;  %s283_s14 = scalar_lea.vmem %s1589_s2, %s895_s8  ;;  %s894_s24 = sshll.u32 %s1316_s29, 2 }
  0x1b   : > { %v308_v3 = vsel %vm307_vm0, %v288_v0, -inf  ;;  %v314_v4 = vsel %vm307_vm0, %v290_v1, -inf  ;;  %v291_v5 = vld [vmem:[%s1322_s7 + $0x18] sm:$0xff]  ;;  %v311_v6 = vsel %vm307_vm0, %v289_v2, -inf  ;;  %v292_v8 = vld [vmem:[%s1322_s7 + $0x20] sm:$0xff]  ;;  %v293_v9 = vld [vmem:[%s1322_s7 + $0x28] sm:$0xff]  ;;  %s279_s5 = scalar_lea.vmem %s1588_s1, %s894_s24 }
  0x1c   : > { %309 = vmax.xlane.f32.xlu0 %v308_v3  ;;  %315 = vmax.xlane.f32.xlu1 %v314_v4  ;;  %v317_v7 = vsel %vm307_vm0, %v291_v5, -inf  ;;  %v320_v10 = vsel %vm307_vm0, %v292_v8, -inf  ;;  %v323_v11 = vsel %vm307_vm0, %v293_v9, -inf  ;;  %v1337_v12 = vld [vmem:[%s1322_s7 + $0x30] sm:$0xff]  ;;  %v1340_v13 = vld [vmem:[%s1322_s7 + $0x38] sm:$0xff]  ;;  %v1347_v16 = vld [vmem:[%s1322_s7 + $0x40] sm:$0xff] }
  0x1d   : > { %v326_v14 = vsel %vm307_vm0, %v1337_v12, -inf  ;;  %v329_v15 = vsel %vm307_vm0, %v1340_v13, -inf  ;;  %v1350_v17 = vld [vmem:[%s1322_s7 + $0x48] sm:$0xff]  ;;  %v332_v18 = vsel %vm307_vm0, %v1347_v16, -inf  ;;  %v1357_v20 = vld [vmem:[%s1322_s7 + $0x50] sm:$0xff]  ;;  %v1360_v21 = vld [vmem:[%s1322_s7 + $0x58] sm:$0xff] }
  0x1e   : > { %v335_v19 = vsel %vm307_vm0, %v1350_v17, -inf  ;;  %v338_v22 = vsel %vm307_vm0, %v1357_v20, -inf  ;;  %v341_v23 = vsel %vm307_vm0, %v1360_v21, -inf  ;;  %v1367_v24 = vld [vmem:[%s1322_s7 + $0x60] sm:$0xff]  ;;  %v1370_v25 = vld [vmem:[%s1322_s7 + $0x68] sm:$0xff]  ;;  %v1377_v28 = vld [vmem:[%s1322_s7 + $0x70] sm:$0xff] }
  0x1f   : > { %v344_v26 = vsel %vm307_vm0, %v1367_v24, -inf  ;;  %v347_v27 = vsel %vm307_vm0, %v1370_v25, -inf  ;;  %v1380_v29 = vld [vmem:[%s1322_s7 + $0x78] sm:$0xff]  ;;  %v350_v30 = vsel %vm307_vm0, %v1377_v28, -inf  ;;  %s260_s29 = sand.u32 1, %s1206_s16   ;;  %s916_s7 = sshll.u32 %s1214_s18, 7 }
  0x20   : > { %312 = vmax.xlane.f32.xlu0 %v311_v6  ;;  %318 = vmax.xlane.f32.xlu1 %v317_v7  ;;  %v353_v31 = vsel %vm307_vm0, %v1380_v29, -inf  ;;  %s891_s6 = sshll.u32 %s260_s29, 3  ;;  %s1540_s12 = scalar_lea.hbm %s1591_s4, %s916_s7 }
  0x21   : > { %s262_s8 = scalar_lea.vmem [#allocation2], %s891_s6  ;;  %s759_s13 = scalar_lea.sflag [#allocation3], %s260_s29 }
  0x22   : > { %s773_s9 = sshll.u32 %s262_s8, 4  ;;  %s1233_s18 = smov [#allocation2]   ;;  %s1542_s9 = int_to_ptr.vmem [resolvable:$true] %s773_s9 }
  0x24   : > { %321 = vmax.xlane.f32.xlu0 %v320_v10  ;;  %324 = vmax.xlane.f32.xlu1 %v323_v11 }
  0x28   : > { %327 = vmax.xlane.f32.xlu0 %v326_v14  ;;  %330 = vmax.xlane.f32.xlu1 %v329_v15 }
  0x2c   : > { %333 = vmax.xlane.f32.xlu0 %v332_v18  ;;  %336 = vmax.xlane.f32.xlu1 %v335_v19 }
  0x30   : > { %339 = vmax.xlane.f32.xlu0 %v338_v22  ;;  %342 = vmax.xlane.f32.xlu1 %v341_v23 }
  0x34   : > { %345 = vmax.xlane.f32.xlu0 %v344_v26  ;;  %348 = vmax.xlane.f32.xlu1 %v347_v27 }
  0x38   : > { %351 = vmax.xlane.f32.xlu0 %v350_v30  ;;  %354 = vmax.xlane.f32.xlu1 %v353_v31 }
  0xa9   : > { %v310_v33 = vpop.xlane.xlu0 %309  ;;  %v316_v34 = vpop.xlane.xlu1 %315 }
  0xaa   : > { %v356_v35 = vsub.f32 %v288_v0, %v310_v33  ;;  %v358_v36 = vsub.f32 %v290_v1, %v316_v34 }
  0xac   : > { %v372_v37 = vmul.f32 1.442695, %v356_v35  ;;  %v376_v38 = vmul.f32 1.442695, %v358_v36 }
  0xad   : > { %v313_v39 = vpop.xlane.xlu0 %312  ;;  %v319_v40 = vpop.xlane.xlu1 %318 }
  0xae   : > { %1076 = vpow2.f32 %v372_v37  ;;  %v357_v41 = vsub.f32 %v289_v2, %v313_v39  ;;  %v359_v42 = vsub.f32 %v291_v5, %v319_v40 }
  0xaf   : > { %1078 = vpow2.f32 %v376_v38 }
  0xb0   : > { %v374_v43 = vmul.f32 1.442695, %v357_v41  ;;  %v378_v44 = vmul.f32 1.442695, %v359_v42 }
  0xb1   : > { %v322_v45 = vpop.xlane.xlu0 %321  ;;  %v325_v46 = vpop.xlane.xlu1 %324 }
  0xb2   : > { %1080 = vpow2.f32 %v374_v43  ;;  %v360_v47 = vsub.f32 %v292_v8, %v322_v45  ;;  %v361_v48 = vsub.f32 %v293_v9, %v325_v46 }
  0xb3   : > { %1082 = vpow2.f32 %v378_v44 }
  0xb4   : > { %v380_v49 = vmul.f32 1.442695, %v360_v47  ;;  %v382_v50 = vmul.f32 1.442695, %v361_v48 }
  0xb5   : > { %v328_v51 = vpop.xlane.xlu0 %327  ;;  %v331_v52 = vpop.xlane.xlu1 %330 }
  0xb6   : > { %1084 = vpow2.f32 %v380_v49  ;;  %v362_v53 = vsub.f32 %v1337_v12, %v328_v51  ;;  %v363_v54 = vsub.f32 %v1340_v13, %v331_v52  ;;  %v1467_v51 = vld [vmem:[%s287_s11] sm:$0xff] }
  0xb7   : > { %1086 = vpow2.f32 %v382_v50  ;;  %v1225_v50 = vmov 0.0|0.0   ;;  %v666_v52 = vmul.f32 0.5, %v1467_v51 }
  0xb8   : > { %v1390_v55 = vpop.eup %1076  ;;  %v384_v56 = vmul.f32 1.442695, %v362_v53  ;;  %v386_v57 = vmul.f32 1.442695, %v363_v54  ;;  %972 = vmatprep.subr.bf16.mxu0 %v1225_v50  ;;  %v305_v53 = vld [vmem:[%s283_s14] sm:$0xff]  ;;  %v1227_v54 = vmov 1  }
  0xb9   : > { %v1392_v58 = vpop.eup %1078  ;;  %v334_v59 = vpop.xlane.xlu0 %333  ;;  %v404_v60 = vsel %vm307_vm0, %v1390_v55, 0.0  ;;  %s1144_s14 = scalar_lea.vmem %s1542_s9, 128 }
  0xba   : > { %v337_v61 = vpop.xlane.xlu1 %336  ;;  %1088 = vpow2.f32 %v384_v56  ;;  %v364_v62 = vsub.f32 %v1347_v16, %v334_v59  ;;  %405 = vadd.xlane.f32.xlu0 %v404_v60  ;;  %v410_v0 = vsel %vm307_vm0, %v1392_v58, 0.0  ;;  %v1229_v56 = vmov 0.0   ;;  %p1145_p12 = scmp.ne.s32.totalorder %s1542_s9, %s1144_s14 }
  0xbb   : > { %v365_v63 = vsub.f32 %v1350_v17, %v337_v61  ;;  %1090 = vpow2.f32 %v386_v57  ;;  %969 = vmatprep.mubr.msk.f32.mxu0 %vm1228_vm1, %v1229_v56 }
  0xbc   : > { %v1400_v1 = vpop.eup %1080  ;;  %v388_v2 = vmul.f32 1.442695, %v364_v62  ;;  %p1146_p13 = pnand %p1145_p12, %p1299_p4 }
  0xbd   : > { %v390_v3 = vmul.f32 1.442695, %v365_v63  ;;  %v1402_v4 = vpop.eup %1082  ;;  %v340_v5 = vpop.xlane.xlu0 %339  ;;  %v407_v6 = vsel %vm307_vm0, %v1400_v1, 0.0 }
  0xbe   : > { %v343_v7 = vpop.xlane.xlu1 %342  ;;  %1092 = vpow2.f32 %v388_v2  ;;  %v366_v8 = vsub.f32 %v1357_v20, %v340_v5  ;;  %411 = vadd.xlane.f32.xlu0 %v410_v0  ;;  %408 = vadd.xlane.f32.xlu1 %v407_v6  ;;  %v413_v10 = vsel %vm307_vm0, %v1402_v4, 0.0  ;;  %p1147_p0 = pneg %p1146_p13 }
  0xbf   : > { %v367_v9 = vsub.f32 %v1360_v21, %v343_v7  ;;  %1094 = vpow2.f32 %v390_v3 }
  0xc0   : > { %v1410_v11 = vpop.eup %1084  ;;  %v392_v12 = vmul.f32 1.442695, %v366_v8 }
  0xc1   : > { %v394_v13 = vmul.f32 1.442695, %v367_v9  ;;  %v1412_v14 = vpop.eup %1086  ;;  %v346_v15 = vpop.xlane.xlu0 %345  ;;  %v416_v16 = vsel %vm307_vm0, %v1410_v11, 0.0 }
  0xc2   : > { %v349_v17 = vpop.xlane.xlu1 %348  ;;  %1096 = vpow2.f32 %v392_v12  ;;  %v368_v18 = vsub.f32 %v1367_v24, %v346_v15  ;;  %414 = vadd.xlane.f32.xlu1 %v413_v10  ;;  %417 = vadd.xlane.f32.xlu0 %v416_v16  ;;  %v419_v20 = vsel %vm307_vm0, %v1412_v14, 0.0 }
  0xc3   : > { %v369_v19 = vsub.f32 %v1370_v25, %v349_v17  ;;  %1098 = vpow2.f32 %v394_v13 }
  0xc4   : > { %v1420_v21 = vpop.eup %1088  ;;  %v396_v22 = vmul.f32 1.442695, %v368_v18 }
  0xc5   : > { %v398_v23 = vmul.f32 1.442695, %v369_v19  ;;  %v1422_v26 = vpop.eup %1090  ;;  %v352_v27 = vpop.xlane.xlu0 %351  ;;  %v422_v30 = vsel %vm307_vm0, %v1420_v21, 0.0 }
  0xc6   : > { %v355_v31 = vpop.xlane.xlu1 %354  ;;  %1100 = vpow2.f32 %v396_v22  ;;  %v370_v24 = vsub.f32 %v1377_v28, %v352_v27  ;;  %420 = vadd.xlane.f32.xlu1 %v419_v20  ;;  %423 = vadd.xlane.f32.xlu0 %v422_v30  ;;  %v425_v33 = vsel %vm307_vm0, %v1422_v26, 0.0 }
  0xc7   : > { %v371_v25 = vsub.f32 %v1380_v29, %v355_v31  ;;  %1102 = vpow2.f32 %v398_v23 }
  0xc8   : > { %v1430_v34 = vpop.eup %1092  ;;  %v400_v35 = vmul.f32 1.442695, %v370_v24 }
  0xc9   : > { %v402_v36 = vmul.f32 1.442695, %v371_v25  ;;  %v1432_v37 = vpop.eup %1094  ;;  %v428_v38 = vsel %vm307_vm0, %v1430_v34, 0.0 }
  0xca   : > { %1104 = vpow2.f32 %v400_v35  ;;  %426 = vadd.xlane.f32.xlu1 %v425_v33  ;;  %429 = vadd.xlane.f32.xlu0 %v428_v38  ;;  %v431_v28 = vsel %vm307_vm0, %v1432_v37, 0.0 }
  0xcb   : > { %1106 = vpow2.f32 %v402_v36 }
  0xcc   : > { %v1438_v29 = vpop.eup %1096 }
  0xcd   : > { %v1440_v39 = vpop.eup %1098  ;;  %v434_v40 = vsel %vm307_vm0, %v1438_v29, 0.0 }
  0xce   : > { %432 = vadd.xlane.f32.xlu1 %v431_v28  ;;  %435 = vadd.xlane.f32.xlu0 %v434_v40  ;;  %v437_v41 = vsel %vm307_vm0, %v1440_v39, 0.0 }
  0xd0   : > { %v1446_v42 = vpop.eup %1100 }
  0xd1   : > { %v1448_v43 = vpop.eup %1102  ;;  %v440_v44 = vsel %vm307_vm0, %v1446_v42, 0.0 }
  0xd2   : > { %438 = vadd.xlane.f32.xlu1 %v437_v41  ;;  %441 = vadd.xlane.f32.xlu0 %v440_v44  ;;  %v443_v45 = vsel %vm307_vm0, %v1448_v43, 0.0 }
  0xd4   : > { %v1454_v46 = vpop.eup %1104 }
  0xd5   : > { %v1456_v47 = vpop.eup %1106  ;;  %v446_v48 = vsel %vm307_vm0, %v1454_v46, 0.0 }
  0xd6   : > { %444 = vadd.xlane.f32.xlu1 %v443_v45  ;;  %447 = vadd.xlane.f32.xlu0 %v446_v48  ;;  %v449_v49 = vsel %vm307_vm0, %v1456_v47, 0.0 }
  0xda   : > { %450 = vadd.xlane.f32.xlu1 %v449_v49 }
  0xeb   : > { %668 = vrot.lane.b32.xlu1 %v666_v52, %s1226_s21  ;;  %s1148_s21 = sshll.u32 %s1233_s18, 4  ;;  %s1149_s21 = int_to_ptr.vmem [resolvable:$false] %s1148_s21 }
  0xec   : > { %487 = vperm.xlu0 %1068, %v305_v53   ;;  %p1151_p1 = scmp.lt.s32.totalorder %s1542_s9, %s1149_s21 }
  0xf0   : > { %1072 = vset.pattern.permute.xlu0 %v1227_v54 }
  0xf1   : > { %630 = vperm.xlu0 %1072, %v1467_v51  }
  0xf5   : > { %1075 = vset.pattern.permute.xlu0 %v1224_v32 }
 0x147   : > { %v406_v57 = vpop.xlane.xlu0 %405 }
 0x148   : > { %1108 = vrcp.f32 %v406_v57 }
 0x14b   : > { %v409_v59 = vpop.xlane.xlu1 %408  ;;  %v412_v60 = vpop.xlane.xlu0 %411 }
 0x14c   : > { %1110 = vrcp.f32 %v409_v59 }
 0x14f   : > { %v415_v61 = vpop.xlane.xlu1 %414  ;;  %v418_v2 = vpop.xlane.xlu0 %417 }
 0x150   : > { %1112 = vrcp.f32 %v415_v61 }
 0x151   : > { %1114 = vrcp.f32 %v412_v60  ;;  %v484_v60 = vlaneseq }
 0x152   : > { %v1109_v63 = vpop.eup %1108 }
 0x153   : > { %v421_v62 = vpop.xlane.xlu1 %420  ;;  %v468_v5 = vmul.f32 %v1109_v63, %v1390_v55  ;;  %v485_v63 = vand.u32 127, %v484_v60  ;;  %v615_v7 = vshrl.u32 %v484_v60, 7 }
 0x154   : > { %1116 = vrcp.f32 %v421_v62 }
 0x155   : > { %1118 = vrcp.f32 %v418_v2 }
 0x156   : > { %v1111_v0 = vpop.eup %1110 }
 0x157   : > { %v427_v3 = vpop.xlane.xlu1 %426  ;;  %v469_v6 = vmul.f32 %v1111_v0, %v1400_v1  ;;  %v424_v1 = vpop.xlane.xlu0 %423 }
 0x158   : > { %1120 = vrcp.f32 %v427_v3 }
 0x159   : > { %v973_v8 = vpack.c.bf16 %v469_v6, %v468_v5  ;;  %1122 = vrcp.f32 %v424_v1 }
 0x15a   : > { %v1113_v9 = vpop.eup %1112 }
 0x15b   : > { %v433_v10 = vpop.xlane.xlu1 %432  ;;  %975 = vmatpush3.bf16.xpose.msk.msra.mxu0 %vm1481_vm2, %v973_v8  ;;  %v1115_v12 = vpop.eup %1114  ;;  %v471_v55 = vmul.f32 %v1113_v9, %v1402_v4 }
 0x15c   : > { %976 = vmatprep.subr.bf16.mxu0 %v1225_v50  ;;  %v470_v15 = vmul.f32 %v1115_v12, %v1392_v58  ;;  %v430_v22 = vpop.xlane.xlu0 %429  ;;  %1124 = vrcp.f32 %v433_v10  ;;  %v627_v10 = vsub.s32 1, %v615_v7  ;;  %v616_v12 = vsub.s32 0, %v615_v7 }
 0x15d   : > { %1126 = vrcp.f32 %v430_v22 }
 0x15e   : > { %v977_v16 = vpack.c.bf16 %v471_v55, %v470_v15  ;;  %v1117_v17 = vpop.eup %1116 }
 0x15f   : > { %v439_v13 = vpop.xlane.xlu1 %438  ;;  %v1119_v19 = vpop.eup %1118  ;;  %v473_v20 = vmul.f32 %v1117_v17, %v1412_v14 }
 0x160   : > { %v472_v4 = vmul.f32 %v1119_v19, %v1410_v11  ;;  %v436_v35 = vpop.xlane.xlu0 %435  ;;  %1128 = vrcp.f32 %v439_v13 }
 0x161   : > { %1130 = vrcp.f32 %v436_v35 }
 0x162   : > { %v981_v27 = vpack.c.bf16 %v473_v20, %v472_v4  ;;  %v1121_v58 = vpop.eup %1120 }
 0x163   : > { %v445_v18 = vpop.xlane.xlu1 %444  ;;  %979 = vmatpush3.bf16.xpose.msk.msra.mxu0 %vm1481_vm2, %v977_v16  ;;  %v1123_v31 = vpop.eup %1122  ;;  %v475_v14 = vmul.f32 %v1121_v58, %v1422_v26 }
 0x164   : > { %980 = vmatprep.subr.bf16.mxu0 %v1225_v50  ;;  %v474_v11 = vmul.f32 %v1123_v31, %v1420_v21  ;;  %v442_v26 = vpop.xlane.xlu0 %441  ;;  %1132 = vrcp.f32 %v445_v18 }
 0x165   : > { %1134 = vrcp.f32 %v442_v26 }
 0x166   : > { %v985_v36 = vpack.c.bf16 %v475_v14, %v474_v11  ;;  %v1125_v38 = vpop.eup %1124 }
 0x167   : > { %v451_v23 = vpop.xlane.xlu1 %450  ;;  %v1127_v28 = vpop.eup %1126  ;;  %v477_v40 = vmul.f32 %v1125_v38, %v1432_v37 }
 0x168   : > { %v476_v41 = vmul.f32 %v1127_v28, %v1430_v34  ;;  %v448_v37 = vpop.xlane.xlu0 %447  ;;  %1136 = vrcp.f32 %v451_v23 }
 0x169   : > { %1138 = vrcp.f32 %v448_v37 }
 0x16a   : > { %v989_v21 = vpack.c.bf16 %v477_v40, %v476_v41  ;;  %v1129_v44 = vpop.eup %1128 }
 0x16b   : > { %v669_v30 = vpop.permute.xlu1 %668  ;;  %983 = vmatpush3.bf16.xpose.msk.msra.mxu0 %vm1481_vm2, %v981_v27  ;;  %v1131_v45 = vpop.eup %1130  ;;  %v479_v48 = vmul.f32 %v1129_v44, %v1440_v39 }
 0x16c   : > { %v671_v24 = vsub.f32 %v1467_v51, %v669_v30  ;;  %v672_v25 = vadd.f32 %v669_v30, %v1467_v51  ;;  %984 = vmatprep.subr.bf16.mxu0 %v1225_v50  ;;  %v478_v49 = vmul.f32 %v1131_v45, %v1438_v29  ;;  %v638_v45 = vsub.s32 2, %v615_v7 }
 0x16e   : > { %v678_v33 = vsub.f32 %v672_v25, %v671_v24  ;;  %v993_v34 = vpack.c.bf16 %v479_v48, %v478_v49  ;;  %v1133_v52 = vpop.eup %1132 }
 0x16f   : > { %v1135_v53 = vpop.eup %1134 }
 0x170   : > { %680 = vrot.lane.b32.xlu1 %v678_v33, %s1230_s22  ;;  %v480_v39 = vmul.f32 %v1135_v53, %v1446_v42  ;;  %s1150_s22 = scalar_lea.vmem %s1149_s21, 256 }
 0x171   : > { %p1152_p2 = scmp.lt.s32.totalorder %s1150_s22, %s1144_s14 }
 0x172   : > { %v1137_v59 = vpop.eup %1136 }
 0x173   : > { %987 = vmatpush3.bf16.xpose.msk.msra.mxu0 %vm1481_vm2, %v985_v36  ;;  %v1139_v29 = vpop.eup %1138  ;;  %v483_v61 = vmul.f32 %v1137_v59, %v1456_v47  ;;  %v1231_v47 = vmov 2   ;;  %v649_v59 = vsub.s32 3, %v615_v7  ;;  %p1153_p3 = por %p1152_p2, %p1151_p1 }
 0x174   : > { %690 = vperm.xlu1 %1069, %v672_v25   ;;  %988 = vmatprep.subr.bf16.mxu0 %v1225_v50  ;;  %v482_v62 = vmul.f32 %v1139_v29, %v1454_v46  ;;  %v1232_v46 = vmov 3  }
 0x175   : > { %p1154_p5 = pnand %p1153_p3, %p1147_p0 }
 0x176   : > { %v1001_v0 = vpack.c.bf16 %v483_v61, %v482_v62 }
 0x178   : > { %700 = vperm.xlu1 %1069, %v671_v24  }
 0x17b   : > { %991 = vmatpush3.bf16.xpose.msk.msra.mxu0 %vm1481_vm2, %v989_v21 }
 0x17c   : > { %1070 = vset.pattern.permute.xlu1 %v1227_v54  ;;  %992 = vmatprep.subr.bf16.mxu0 %v1225_v50  ;;  %v481_v54 = vmul.f32 %v1133_v52, %v1448_v43  ;;  %v488_v43 = vpop.permute.xlu0 %487 }
 0x17d   : > { %711 = vperm.xlu1 %1070, %v672_v25   ;;  %vm489_vm3 = vcmp.eq.s32.totalorder %v485_v63, %v488_v43 }
 0x17e   : > { %v997_v57 = vpack.c.bf16 %v481_v54, %v480_v39 }
 0x180   : > { %v631_v52 = vpop.permute.xlu0 %630 }
 0x181   : > { %720 = vperm.xlu1 %1070, %v671_v24  }
 0x183   : > { %995 = vmatpush3.bf16.xpose.msk.msra.mxu0 %vm1481_vm2, %v993_v34 }
 0x184   : > { %996 = vmatprep.subr.bf16.mxu0 %v1225_v50 }
 0x185   : > { %1071 = vset.pattern.permute.xlu1 %v1224_v32  ;;  %v897_v32 = vsel %vm489_vm3, 1.0, %v1229_v56  ;;  %v304_v56 = vld [vmem:[%s279_s5] sm:$0xf] }
 0x186   : > { %v660_v5 = vmul.f32 0.5, %v304_v56  ;;  %v617_v37 = vrot.slane %v304_v56, %v616_v12  ;;  %v628_v49 = vrot.slane %v304_v56, %v627_v10  ;;  %v639_v54 = vrot.slane %v304_v56, %v638_v45 }
 0x187   : > { %v650_v43 = vrot.slane %v304_v56, %v649_v59 }
 0x188   : > { %v662_v8 = vrot.slane %v660_v5, 2 }
 0x18a   : > { %v664_v9 = vsub.f32 %v304_v56, %v662_v8  ;;  %v665_v55 = vadd.f32 %v662_v8, %v304_v56 }
 0x18b   : > { %999 = vmatpush3.bf16.xpose.msk.msra.mxu0 %vm1481_vm2, %v997_v57  ;;  %v633_v57 = vsub.f32 %v628_v49, %v631_v52 }
 0x18c   : > { %1000 = vmatprep.subr.bf16.mxu0 %v1225_v50  ;;  %v718_v1 = vrot.slane %v664_v9, %v627_v10  ;;  %v697_v15 = vrot.slane %v664_v9, %v616_v12  ;;  %v673_v16 = vsub.f32 %v665_v55, %v664_v9  ;;  %v687_v17 = vrot.slane %v665_v55, %v616_v12 }
 0x18e   : > { %v675_v23 = vrot.slane %v673_v16, 1 }
 0x190   : > { %v677_v14 = vmul.f32 %v675_v23, %v673_v16 }
 0x192   : > { %v730_v38 = vrot.slane %v677_v14, %v616_v12 }
 0x193   : > { %1003 = vmatpush3.bf16.xpose.msk.msra.mxu0 %vm1481_vm2, %v1001_v0  ;;  %v634_v0 = vand.u32 2147483647, %v633_v57 }
 0x19a   : > { %970 = vmatmul.mubr.msk.f32.vlgmr.msra.gmra.mrb[0].mxu0 %vm307_vm0, %v897_v32 }
 0x1e2   : > { %v681_v42 = vpop.permute.xlu1 %680 }
 0x1e3   : > { %v683_v2 = vmul.f32 %v681_v42, %v678_v33 }
 0x1e5   : > { %733 = vperm.xlu1 %1071, %v683_v2  }
 0x1e9   : > { %620 = vperm.xlu1 %1071, %v1467_v51  }
 0x1ed   : > { %1073 = vset.pattern.permute.xlu1 %v1231_v47 }
 0x1ee   : > { %641 = vperm.xlu1 %1073, %v1467_v51  }
 0x1f2   : > { %1074 = vset.pattern.permute.xlu1 %v1232_v46 }
 0x1f3   : > { %652 = vperm.xlu1 %1074, %v1467_v51   ;;  %v691_v50 = vpop.permute.xlu1 %690  ;;  %v709_v51 = vrot.slane %v665_v55, %v627_v10 }
 0x1f4   : > { %v739_v4 = vmax.f32 %v687_v17, %v691_v50  ;;  %v693_v24 = vmin.f32 %v687_v17, %v691_v50 }
 0x1f7   : > { %v701_v3 = vpop.permute.xlu1 %700 }
 0x1f8   : > { %v740_v19 = vmin.f32 %v697_v15, %v701_v3  ;;  %v703_v58 = vmax.f32 %v697_v15, %v701_v3 }
 0x1fa   : > { %v741_v31 = vsub.f32 %v739_v4, %v740_v19  ;;  %v704_v35 = vsub.f32 %v693_v24, %v703_v58 }
 0x1fc   : > { %v712_v6 = vpop.permute.xlu1 %711  ;;  %v742_v11 = vmax.f32 %v741_v31, 0.0  ;;  %v705_v40 = vmax.f32 %v704_v35, 0.0 }
 0x1fd   : > { %v743_v20 = vmax.f32 %v709_v51, %v712_v6  ;;  %v714_v30 = vmin.f32 %v709_v51, %v712_v6 }
 0x200   : > { %v721_v13 = vpop.permute.xlu1 %720 }
 0x201   : > { %v744_v18 = vmin.f32 %v718_v1, %v721_v13  ;;  %v723_v22 = vmax.f32 %v718_v1, %v721_v13 }
 0x203   : > { %v745_v27 = vsub.f32 %v743_v20, %v744_v18  ;;  %v724_v25 = vsub.f32 %v714_v30, %v723_v22 }
 0x205   : > { %v746_v33 = vmax.f32 %v745_v27, 0.0  ;;  %v725_v36 = vmax.f32 %v724_v25, 0.0 }
 0x207   : > { %v747_v28 = vmul.f32 %v746_v33, %v742_v11  ;;  %v726_v41 = vmul.f32 %v725_v36, %v705_v40 }
 0x209   : > { %v748_v44 = vmax.f32 %v747_v28, 1e-09 }
 0x20b   : > { %1140 = vrcp.f32 %v748_v44 }
 0x215   : > { %v1141_v50 = vpop.eup %1140 }
 0x264   : > { %v734_v26 = vpop.permute.xlu1 %733 }
 0x265   : > { %v736_v21 = vadd.f32 %v734_v26, %v730_v38 }
 0x267   : > { %v737_v48 = vsub.f32 %v736_v21, %v726_v41 }
 0x268   : > { %v621_v34 = vpop.permute.xlu1 %620 }
 0x269   : > { %v738_v53 = vmax.f32 %v737_v48, 1e-09  ;;  %v623_v39 = vsub.f32 %v617_v37, %v621_v34 }
 0x26b   : > { %1142 = vrcp.f32 %v738_v53  ;;  %v624_v63 = vand.u32 2147483647, %v623_v39  ;;  %v751_v42 = vsub.f32 %v748_v44, %v738_v53 }
 0x26d   : > { %v642_v29 = vpop.permute.xlu1 %641  ;;  %v609_v60 = vpop.f32.mrb[0].mxu0  ;;  %v635_v47 = vadd.f32 %v634_v0, %v624_v63  ;;  %v753_v8 = vmul.f32 %v1141_v50, %v751_v42 }
 0x26e   : > { %v644_v61 = vsub.f32 %v639_v54, %v642_v29  ;;  %v971_v62 = vpop.f32.mrb[1].mxu0  ;;  %v613_v10 = vmul.f32 -1.0, %v609_v60 }
 0x270   : > { %v645_v32 = vand.u32 2147483647, %v644_v61 }
 0x272   : > { %v653_v2 = vpop.permute.xlu1 %652  ;;  %v646_v5 = vadd.f32 %v645_v32, %v635_v47 }
 0x273   : > { %v655_v46 = vsub.f32 %v650_v43, %v653_v2 }
 0x275   : > { %v1143_v3 = vpop.eup %1142  ;;  %v656_v6 = vand.u32 2147483647, %v655_v46 }
 0x276   : > { %v750_v7 = vmul.f32 %v1143_v3, %v726_v41 }
 0x277   : > { %v657_v9 = vadd.f32 %v656_v6, %v646_v5 }
 0x278   : > { %v754_v12 = vsub.f32 %v750_v7, %v753_v8 }
 0x279   : > { %v658_v55 = vmul.f32 5.0, %v657_v9 }
 0x27a   : > { %v755_v56 = vmul.f32 2.0, %v754_v12 }
 0x27b   : > { %v659_v1 = vadd.f32 %v658_v55, %v613_v10 }
 0x27d   : > { %v756_v13 = vsub.f32 %v659_v1, %v755_v56 }
 0x27f   : > { %757 = vst [vmem:[%s262_s8] sm:$0xff] %v756_v13 }
 0x280   : > { %1157 = shalt.err (!%p1154_p5)
}
 0x281   : > { %s1158_s24 = scalar_lea.hbm %s1540_s12, 128  ;;  %s1162_s5 = scalar_lea.hbm %s1591_s4, 256 }
 0x282   : > { %p1159_p6 = scmp.ne.s32.totalorder %s1540_s12, %s1158_s24  ;;  %p1163_p10 = scmp.lt.u32.totalorder %s1540_s12, %s1591_s4 }
 0x283   : > { %p1164_p11 = scmp.lt.u32.totalorder %s1162_s5, %s1158_s24  ;;  %p1166_p13 = scmp.lt.u32.totalorder %s1158_s24, %s1540_s12 }
 0x284   : > { %p1160_p7 = pnand %p1159_p6, %p1299_p4 }
 0x285   : > { %p1165_p12 = por %p1164_p11, %p1163_p10 }
 0x286   : > { %p1161_p9 = pneg %p1160_p7 }
 0x287   : > { %p1167_p0 = por %p1166_p13, %p1165_p12 }
 0x289   : > { %p1168_p1 = pnand %p1167_p0, %p1161_p9 }
 0x28b   : > { %1171 = shalt.err (!%p1168_p1)
}
 0x28c   : > { %1004 = dma.vmem_to_hbm [thread:$0]  (%p1299_p4), %s1542_s9, 128, %s1540_s12, %s759_s13  }
 0x28d PF: > { %p1010_p2 = scmp.ge.s32.totalorder %s1222_s20, 2  ;;  %s785_s7 = sand.u32 1, %s1202_s15  }
 0x28e   : > { %s786_s8 = scalar_lea.sflag [#allocation3], %s785_s7 }
 0x28f   : > { %p1007_p3 = pnand %p1010_p2, %p1306_p8 }
 0x291   : > { %1197 = dma.done.wait (!%p1007_p3), %s786_s8, 128  }
 0x292   : > { %1199 = vsyncadd (!%p1007_p3), %s786_s8, 4294967168  ;;  %s17_s20 = sadd.s32 1, %s1222_s20   ;;  %s1596_s15 = smov %s1206_s16 }
 0x293   : > { %p14_p5 = scmp.ge.s32.totalorder %s17_s20, 4   ;;  %s1597_s16 = smov %s1210_s17 }
 0x294   : > { %s1598_s17 = smov %s1312_s28  ;;  %s1599_s18 = smov %s1218_s19 }
 0x295   : > { %s1600_s19 = smov %s1602_s23  ;;  %16 = sbr.rel (!%p14_p5) target bundleno = 4 (0x4), region = 80 }
 0x29c   :  { %791 = vsyncpa [#allocation3], 1 }
 0x29d   :  { %793 = vsyncpa [#allocation3 + $0x1], 1 }

</bundles_post_ra>
